<compile_context>
chip_gen: v5e
topology: v5e:2x2
jax: 0.10.0
libtpu: 0.0.40
codegen_flags: <defaults>
</compile_context>

<pallas_src>
import functools

import jax
import jax.numpy as jnp
from jax.experimental import pallas as pl
from jax.experimental.pallas import tpu as pltpu


def _noise_rnn_kernel(eps_min,
                      tall_ref,
                      wih0_ref, whh0_ref, b0_ref,
                      w1s_ref, b1_ref,
                      wtall_ref, bt_ref, wn_ref, bn_ref,
                      out_ref):
    f32 = jnp.float32
    B = tall_ref.shape[0]
    L = tall_ref.shape[1] // 3
    H = whh0_ref.shape[0]

    t_all = tall_ref[...]                       # (B, 3L) = [t | t_rev | t_rev_sh]
    t = t_all[:, 0:L]
    t_rev = t_all[:, L:2 * L]
    t_rev_sh = t_all[:, 2 * L:3 * L]

    wih0 = wih0_ref[...]                        # (1, H)
    whh0 = whh0_ref[...]                        # (H, H)
    b0 = b0_ref[...]                            # (1, H)  = bih0 + bhh0
    w1s = w1s_ref[...]                          # (2H, H) = [Wih1^T ; Whh1^T]
    b1 = b1_ref[...]                            # (1, H)  = bih1 + bhh1

    # 2-layer ReLU RNN over the reversed sequence, statically unrolled (L small).
    h0 = jnp.zeros((B, H), f32)
    h1 = jnp.zeros((B, H), f32)
    h1_cols = []
    for l in range(L):
        x_t = t_rev[:, l:l + 1]                                    # (B, 1)
        # layer 0: input term on the VPU (outer product), recurrence on the MXU
        h0 = jnp.maximum(
            x_t * wih0
            + jnp.dot(h0, whh0, preferred_element_type=f32) + b0, 0.0)
        # layer 1: single fused matmul with stacked weights
        h01 = jnp.concatenate([h0, h1], axis=1)                    # (B, 2H)
        h1 = jnp.maximum(
            jnp.dot(h01, w1s, preferred_element_type=f32) + b1, 0.0)
        h1_cols.append(h1)

    h1_all = jnp.concatenate(h1_cols, axis=1)                      # (B, L*H)

    # Batched time_linear fused with the flip / shift column selections:
    #   columns [0:L)    -> eps_pre            (RNN step order)
    #   columns [L:2L)   -> eps_pre reversed
    #   columns [2L:3L)  -> eps_pre reversed & rolled-by-1 with [:,0]=[:,1]
    eps_pre_all = (jnp.dot(h1_all, wtall_ref[...],
                           preferred_element_type=f32) + bt_ref[...])
    mask_all = (t_all != 0.0).astype(f32)       # get_non_pad_mask per column
    eps_all = (jnp.tanh(eps_pre_all) + eps_min) * mask_all

    eps_net = eps_all[:, 0:L]
    eps_net_rev = eps_all[:, L:2 * L]
    eps_net_rev_sh = eps_all[:, 2 * L:3 * L]

    noise_diff = eps_net_rev_sh - eps_net_rev
    time_delta = t_rev - t_rev_sh
    hinge = jnp.maximum(
        time_delta
        - (jnp.dot(noise_diff, wn_ref[...], preferred_element_type=f32)
           + bn_ref[...]), 0.0)
    pos_hinge = jnp.maximum(eps_min - (t + eps_net), 0.0)

    # Single lane-dense packed store; wrapper splits.
    out_ref[...] = jnp.concatenate([eps_net, noise_diff, hinge, pos_hinge],
                                   axis=1)


def noise_rnn_forward(time_input, kparams, eps_min=1e-5):
    B, L = time_input.shape
    t = time_input.astype(jnp.float32)
    # Input-side flip / shift is layout plumbing done once in the wrapper.
    t_rev = t[:, ::-1]
    t_rev_sh = jnp.concatenate([t_rev[:, :1], t_rev[:, :-1]], axis=1)
    t_all = jnp.concatenate([t, t_rev, t_rev_sh], axis=1)          # (B, 3L)

    kernel = functools.partial(_noise_rnn_kernel, eps_min)
    vmem = pl.BlockSpec(memory_space=pltpu.MemorySpace.VMEM)
    args = (t_all,
            kparams["wih0_r"], kparams["whh0_t"], kparams["b0"],
            kparams["w1s"], kparams["b1"],
            kparams["wt_all"], kparams["bt"], kparams["wn_t"], kparams["bn"])
    out = pl.pallas_call(
        kernel,
        out_shape=jax.ShapeDtypeStruct((B, 4 * L), jnp.float32),
        in_specs=[vmem] * len(args),
        out_specs=vmem,
    )(*args)
    eps_net = out[:, 0:L]
    noise_diff = out[:, L:2 * L]
    hinge = out[:, 2 * L:3 * L]
    pos_hinge = out[:, 3 * L:4 * L]
    return eps_net, noise_diff, hinge, pos_hinge


def init_params(key, H, L):
    """Raw params mimicking PyTorch defaults (U(-1/sqrt(fan), 1/sqrt(fan)))."""
    def u(k, shape, bound):
        return jax.random.uniform(k, shape, jnp.float32, -bound, bound)
    ks = jax.random.split(key, 12)
    kh = 1.0 / float(H) ** 0.5
    kl = 1.0 / float(L) ** 0.5
    W_ih0 = u(ks[0], (H, 1), kh); W_hh0 = u(ks[1], (H, H), kh)
    b_ih0 = u(ks[2], (H,), kh);   b_hh0 = u(ks[3], (H,), kh)
    W_ih1 = u(ks[4], (H, H), kh); W_hh1 = u(ks[5], (H, H), kh)
    b_ih1 = u(ks[6], (H,), kh);   b_hh1 = u(ks[7], (H,), kh)
    W_t = u(ks[8], (1, H), kh);   b_t = u(ks[9], (1,), kh)
    W_n = u(ks[10], (L, L), kl);  b_n = u(ks[11], (L,), kl)
    return dict(
        wih0_r=W_ih0.reshape(1, H), whh0_t=W_hh0.T,
        bih0=b_ih0.reshape(1, H), bhh0=b_hh0.reshape(1, H),
        wih1_t=W_ih1.T, whh1_t=W_hh1.T,
        bih1=b_ih1.reshape(1, H), bhh1=b_hh1.reshape(1, H),
        wt_t=W_t.T, bt=b_t.reshape(1, 1),
        wn_t=W_n.T, bn=b_n.reshape(1, L),
    )


def prep_params(p, H, L):
    """Kernel-ready params: fused biases, stacked layer-1 weights, and the
    block-structured time_linear matrix that also realizes flip / shift."""
    wt = p["wt_t"].reshape(H)                                   # (H,)
    WT = jnp.zeros((L * H, 3 * L), jnp.float32)
    for c in range(L):
        WT = WT.at[c * H:(c + 1) * H, c].set(wt)                # eps_pre
        r = L - 1 - c
        WT = WT.at[r * H:(r + 1) * H, L + c].set(wt)            # eps_pre reversed
        s = max(c - 1, 0)
        rs = L - 1 - s
        WT = WT.at[rs * H:(rs + 1) * H, 2 * L + c].set(wt)      # reversed+shifted
    return dict(
        wih0_r=p["wih0_r"],
        whh0_t=p["whh0_t"],
        b0=p["bih0"] + p["bhh0"],
        w1s=jnp.concatenate([p["wih1_t"], p["whh1_t"]], axis=0),
        b1=p["bih1"] + p["bhh1"],
        wt_all=WT,
        bt=p["bt"],
        wn_t=p["wn_t"],
        bn=p["bn"],
    )


def reference_forward(time_input, params, eps_min=1e-5):
    """Pure-JAX replica of the PyTorch forward (correctness check)."""
    B, L = time_input.shape
    H = params["whh0_t"].shape[0]
    t = time_input
    t_rev = t[:, ::-1]
    h0 = jnp.zeros((B, H), jnp.float32)
    h1 = jnp.zeros((B, H), jnp.float32)
    cols = []
    for l in range(L):
        x = t_rev[:, l:l + 1]
        h0 = jax.nn.relu(x @ params["wih0_r"] + params["bih0"]
                         + h0 @ params["whh0_t"] + params["bhh0"])
        h1 = jax.nn.relu(h0 @ params["wih1_t"] + params["bih1"]
                         + h1 @ params["whh1_t"] + params["bhh1"])
        cols.append(h1 @ params["wt_t"] + params["bt"])
    eps_raw = jnp.concatenate(cols, axis=1)
    eps = jnp.tanh(eps_raw) + eps_min
    eps = eps * (t != 0.0).astype(jnp.float32)
    eps_rev = eps[:, ::-1]
    shift = lambda x: jnp.concatenate([x[:, :1], x[:, :-1]], axis=1)
    eps_rev_sh = shift(eps_rev)       # == torch.roll(.,1) then [:,0]=[:,1]
    t_rev_sh = shift(t_rev)
    noise_diff = eps_rev_sh - eps_rev
    time_delta = t_rev - t_rev_sh
    hinge = jax.nn.relu(time_delta - (noise_diff @ params["wn_t"] + params["bn"]))
    pos = jax.nn.relu(eps_min - (t + eps))
    return eps, noise_diff, hinge, pos


if __name__ == "__main__":
    B, L, H = 2, 8, 32      # batch=2, pad_max_len=8, d_noise_rnn=32, 2 RNN layers
    key = jax.random.PRNGKey(0)
    kp, kt = jax.random.split(key)
    params = init_params(kp, H, L)
    kparams = prep_params(params, H, L)

    # Increasing event times with zero padding at the tail of batch 0.
    dt = jax.random.uniform(kt, (B, L), jnp.float32, 0.1, 1.0)
    time_input = jnp.cumsum(dt, axis=1)
    time_input = time_input * jnp.ones((B, L), jnp.float32).at[0, L - 2:].set(0.0)

    # NOTE: type_input is only used by the NOISE_TRANSFORMER branch; the RNN
    # branch implemented here ignores it (as in the PyTorch forward).
    outs = noise_rnn_forward(time_input, kparams)
    outs = jax.block_until_ready(outs)

    refs = reference_forward(time_input, params)
    for name, o, r in zip(("eps_net", "noise_diff", "hinge", "pos_hinge"),
                          outs, refs):
        assert jnp.allclose(o, r, atol=1e-4, rtol=1e-4), (name, o, r)

    print("KERNEL_OK")
</pallas_src>

<mosaic_0001>
module attributes {stable_mosaic.version = 11 : i64} {
  func.func @_noise_rnn_kernel(%arg0: memref<2x24xf32, #tpu.memory_space<vmem>>, %arg1: memref<1x32xf32, #tpu.memory_space<vmem>>, %arg2: memref<32x32xf32, #tpu.memory_space<vmem>>, %arg3: memref<1x32xf32, #tpu.memory_space<vmem>>, %arg4: memref<64x32xf32, #tpu.memory_space<vmem>>, %arg5: memref<1x32xf32, #tpu.memory_space<vmem>>, %arg6: memref<256x24xf32, #tpu.memory_space<vmem>>, %arg7: memref<1x1xf32, #tpu.memory_space<vmem>>, %arg8: memref<8x8xf32, #tpu.memory_space<vmem>>, %arg9: memref<1x8xf32, #tpu.memory_space<vmem>>, %arg10: memref<2x32xf32, #tpu.memory_space<vmem>>) attributes {dimension_semantics = [], scalar_prefetch = 0 : i64, scratch_operands = 0 : i64, tpu.core_type = #tpu.core_type<tc>} {
    %c0 = arith.constant 0 : index
    %c0_0 = arith.constant 0 : index
    %0 = vector.load %arg0[%c0, %c0_0] : memref<2x24xf32, #tpu.memory_space<vmem>>, vector<2x24xf32>
    %1 = vector.extract_strided_slice %0 {offsets = [0, 0], sizes = [2, 8], strides = [1, 1]} : vector<2x24xf32> to vector<2x8xf32>
    %2 = vector.extract_strided_slice %0 {offsets = [0, 8], sizes = [2, 8], strides = [1, 1]} : vector<2x24xf32> to vector<2x8xf32>
    %3 = vector.extract_strided_slice %0 {offsets = [0, 16], sizes = [2, 8], strides = [1, 1]} : vector<2x24xf32> to vector<2x8xf32>
    %c0_1 = arith.constant 0 : index
    %c0_2 = arith.constant 0 : index
    %4 = vector.load %arg1[%c0_1, %c0_2] : memref<1x32xf32, #tpu.memory_space<vmem>>, vector<1x32xf32>
    %c0_3 = arith.constant 0 : index
    %c0_4 = arith.constant 0 : index
    %5 = vector.load %arg2[%c0_3, %c0_4] : memref<32x32xf32, #tpu.memory_space<vmem>>, vector<32x32xf32>
    %c0_5 = arith.constant 0 : index
    %c0_6 = arith.constant 0 : index
    %6 = vector.load %arg3[%c0_5, %c0_6] : memref<1x32xf32, #tpu.memory_space<vmem>>, vector<1x32xf32>
    %c0_7 = arith.constant 0 : index
    %c0_8 = arith.constant 0 : index
    %7 = vector.load %arg4[%c0_7, %c0_8] : memref<64x32xf32, #tpu.memory_space<vmem>>, vector<64x32xf32>
    %c0_9 = arith.constant 0 : index
    %c0_10 = arith.constant 0 : index
    %8 = vector.load %arg5[%c0_9, %c0_10] : memref<1x32xf32, #tpu.memory_space<vmem>>, vector<1x32xf32>
    %cst = arith.constant 0.000000e+00 : f32
    %9 = vector.broadcast %cst : f32 to vector<2x32xf32>
    %cst_11 = arith.constant 0.000000e+00 : f32
    %10 = vector.broadcast %cst_11 : f32 to vector<2x32xf32>
    %11 = vector.extract_strided_slice %2 {offsets = [0, 0], sizes = [2, 1], strides = [1, 1]} : vector<2x8xf32> to vector<2x1xf32>
    %12 = vector.broadcast %11 : vector<2x1xf32> to vector<2x32xf32>
    %13 = vector.broadcast %4 : vector<1x32xf32> to vector<2x32xf32>
    %14 = arith.mulf %12, %13 : vector<2x32xf32>
    %cst_12 = arith.constant dense<0.000000e+00> : vector<2x32xf32>
    %15 = tpu.matmul %9, %5, %cst_12 {dimension_numbers = #tpu.dot_dimension_numbers<[1], [0], [0], [1], [0, 0, 1, 1], [], []>} : vector<2x32xf32>, vector<32x32xf32>, vector<2x32xf32> -> vector<2x32xf32>
    %16 = arith.addf %14, %15 : vector<2x32xf32>
    %17 = vector.broadcast %6 : vector<1x32xf32> to vector<2x32xf32>
    %18 = arith.addf %16, %17 : vector<2x32xf32>
    %cst_13 = arith.constant 0.000000e+00 : f32
    %19 = vector.broadcast %cst_13 : f32 to vector<2x32xf32>
    %20 = arith.maximumf %18, %19 : vector<2x32xf32>
    %21 = tpu.concatenate %20, %10 in 1 : vector<2x32xf32>, vector<2x32xf32> -> vector<2x64xf32>
    %cst_14 = arith.constant dense<0.000000e+00> : vector<2x32xf32>
    %22 = tpu.matmul %21, %7, %cst_14 {dimension_numbers = #tpu.dot_dimension_numbers<[1], [0], [0], [1], [0, 0, 1, 1], [], []>} : vector<2x64xf32>, vector<64x32xf32>, vector<2x32xf32> -> vector<2x32xf32>
    %23 = vector.broadcast %8 : vector<1x32xf32> to vector<2x32xf32>
    %24 = arith.addf %22, %23 : vector<2x32xf32>
    %cst_15 = arith.constant 0.000000e+00 : f32
    %25 = vector.broadcast %cst_15 : f32 to vector<2x32xf32>
    %26 = arith.maximumf %24, %25 : vector<2x32xf32>
    %27 = vector.extract_strided_slice %2 {offsets = [0, 1], sizes = [2, 1], strides = [1, 1]} : vector<2x8xf32> to vector<2x1xf32>
    %28 = vector.broadcast %27 : vector<2x1xf32> to vector<2x32xf32>
    %29 = vector.broadcast %4 : vector<1x32xf32> to vector<2x32xf32>
    %30 = arith.mulf %28, %29 : vector<2x32xf32>
    %cst_16 = arith.constant dense<0.000000e+00> : vector<2x32xf32>
    %31 = tpu.matmul %20, %5, %cst_16 {dimension_numbers = #tpu.dot_dimension_numbers<[1], [0], [0], [1], [0, 0, 1, 1], [], []>} : vector<2x32xf32>, vector<32x32xf32>, vector<2x32xf32> -> vector<2x32xf32>
    %32 = arith.addf %30, %31 : vector<2x32xf32>
    %33 = vector.broadcast %6 : vector<1x32xf32> to vector<2x32xf32>
    %34 = arith.addf %32, %33 : vector<2x32xf32>
    %cst_17 = arith.constant 0.000000e+00 : f32
    %35 = vector.broadcast %cst_17 : f32 to vector<2x32xf32>
    %36 = arith.maximumf %34, %35 : vector<2x32xf32>
    %37 = tpu.concatenate %36, %26 in 1 : vector<2x32xf32>, vector<2x32xf32> -> vector<2x64xf32>
    %cst_18 = arith.constant dense<0.000000e+00> : vector<2x32xf32>
    %38 = tpu.matmul %37, %7, %cst_18 {dimension_numbers = #tpu.dot_dimension_numbers<[1], [0], [0], [1], [0, 0, 1, 1], [], []>} : vector<2x64xf32>, vector<64x32xf32>, vector<2x32xf32> -> vector<2x32xf32>
    %39 = vector.broadcast %8 : vector<1x32xf32> to vector<2x32xf32>
    %40 = arith.addf %38, %39 : vector<2x32xf32>
    %cst_19 = arith.constant 0.000000e+00 : f32
    %41 = vector.broadcast %cst_19 : f32 to vector<2x32xf32>
    %42 = arith.maximumf %40, %41 : vector<2x32xf32>
    %43 = vector.extract_strided_slice %2 {offsets = [0, 2], sizes = [2, 1], strides = [1, 1]} : vector<2x8xf32> to vector<2x1xf32>
    %44 = vector.broadcast %43 : vector<2x1xf32> to vector<2x32xf32>
    %45 = vector.broadcast %4 : vector<1x32xf32> to vector<2x32xf32>
    %46 = arith.mulf %44, %45 : vector<2x32xf32>
    %cst_20 = arith.constant dense<0.000000e+00> : vector<2x32xf32>
    %47 = tpu.matmul %36, %5, %cst_20 {dimension_numbers = #tpu.dot_dimension_numbers<[1], [0], [0], [1], [0, 0, 1, 1], [], []>} : vector<2x32xf32>, vector<32x32xf32>, vector<2x32xf32> -> vector<2x32xf32>
    %48 = arith.addf %46, %47 : vector<2x32xf32>
    %49 = vector.broadcast %6 : vector<1x32xf32> to vector<2x32xf32>
    %50 = arith.addf %48, %49 : vector<2x32xf32>
    %cst_21 = arith.constant 0.000000e+00 : f32
    %51 = vector.broadcast %cst_21 : f32 to vector<2x32xf32>
    %52 = arith.maximumf %50, %51 : vector<2x32xf32>
    %53 = tpu.concatenate %52, %42 in 1 : vector<2x32xf32>, vector<2x32xf32> -> vector<2x64xf32>
    %cst_22 = arith.constant dense<0.000000e+00> : vector<2x32xf32>
    %54 = tpu.matmul %53, %7, %cst_22 {dimension_numbers = #tpu.dot_dimension_numbers<[1], [0], [0], [1], [0, 0, 1, 1], [], []>} : vector<2x64xf32>, vector<64x32xf32>, vector<2x32xf32> -> vector<2x32xf32>
    %55 = vector.broadcast %8 : vector<1x32xf32> to vector<2x32xf32>
    %56 = arith.addf %54, %55 : vector<2x32xf32>
    %cst_23 = arith.constant 0.000000e+00 : f32
    %57 = vector.broadcast %cst_23 : f32 to vector<2x32xf32>
    %58 = arith.maximumf %56, %57 : vector<2x32xf32>
    %59 = vector.extract_strided_slice %2 {offsets = [0, 3], sizes = [2, 1], strides = [1, 1]} : vector<2x8xf32> to vector<2x1xf32>
    %60 = vector.broadcast %59 : vector<2x1xf32> to vector<2x32xf32>
    %61 = vector.broadcast %4 : vector<1x32xf32> to vector<2x32xf32>
    %62 = arith.mulf %60, %61 : vector<2x32xf32>
    %cst_24 = arith.constant dense<0.000000e+00> : vector<2x32xf32>
    %63 = tpu.matmul %52, %5, %cst_24 {dimension_numbers = #tpu.dot_dimension_numbers<[1], [0], [0], [1], [0, 0, 1, 1], [], []>} : vector<2x32xf32>, vector<32x32xf32>, vector<2x32xf32> -> vector<2x32xf32>
    %64 = arith.addf %62, %63 : vector<2x32xf32>
    %65 = vector.broadcast %6 : vector<1x32xf32> to vector<2x32xf32>
    %66 = arith.addf %64, %65 : vector<2x32xf32>
    %cst_25 = arith.constant 0.000000e+00 : f32
    %67 = vector.broadcast %cst_25 : f32 to vector<2x32xf32>
    %68 = arith.maximumf %66, %67 : vector<2x32xf32>
    %69 = tpu.concatenate %68, %58 in 1 : vector<2x32xf32>, vector<2x32xf32> -> vector<2x64xf32>
    %cst_26 = arith.constant dense<0.000000e+00> : vector<2x32xf32>
    %70 = tpu.matmul %69, %7, %cst_26 {dimension_numbers = #tpu.dot_dimension_numbers<[1], [0], [0], [1], [0, 0, 1, 1], [], []>} : vector<2x64xf32>, vector<64x32xf32>, vector<2x32xf32> -> vector<2x32xf32>
    %71 = vector.broadcast %8 : vector<1x32xf32> to vector<2x32xf32>
    %72 = arith.addf %70, %71 : vector<2x32xf32>
    %cst_27 = arith.constant 0.000000e+00 : f32
    %73 = vector.broadcast %cst_27 : f32 to vector<2x32xf32>
    %74 = arith.maximumf %72, %73 : vector<2x32xf32>
    %75 = vector.extract_strided_slice %2 {offsets = [0, 4], sizes = [2, 1], strides = [1, 1]} : vector<2x8xf32> to vector<2x1xf32>
    %76 = vector.broadcast %75 : vector<2x1xf32> to vector<2x32xf32>
    %77 = vector.broadcast %4 : vector<1x32xf32> to vector<2x32xf32>
    %78 = arith.mulf %76, %77 : vector<2x32xf32>
    %cst_28 = arith.constant dense<0.000000e+00> : vector<2x32xf32>
    %79 = tpu.matmul %68, %5, %cst_28 {dimension_numbers = #tpu.dot_dimension_numbers<[1], [0], [0], [1], [0, 0, 1, 1], [], []>} : vector<2x32xf32>, vector<32x32xf32>, vector<2x32xf32> -> vector<2x32xf32>
    %80 = arith.addf %78, %79 : vector<2x32xf32>
    %81 = vector.broadcast %6 : vector<1x32xf32> to vector<2x32xf32>
    %82 = arith.addf %80, %81 : vector<2x32xf32>
    %cst_29 = arith.constant 0.000000e+00 : f32
    %83 = vector.broadcast %cst_29 : f32 to vector<2x32xf32>
    %84 = arith.maximumf %82, %83 : vector<2x32xf32>
    %85 = tpu.concatenate %84, %74 in 1 : vector<2x32xf32>, vector<2x32xf32> -> vector<2x64xf32>
    %cst_30 = arith.constant dense<0.000000e+00> : vector<2x32xf32>
    %86 = tpu.matmul %85, %7, %cst_30 {dimension_numbers = #tpu.dot_dimension_numbers<[1], [0], [0], [1], [0, 0, 1, 1], [], []>} : vector<2x64xf32>, vector<64x32xf32>, vector<2x32xf32> -> vector<2x32xf32>
    %87 = vector.broadcast %8 : vector<1x32xf32> to vector<2x32xf32>
    %88 = arith.addf %86, %87 : vector<2x32xf32>
    %cst_31 = arith.constant 0.000000e+00 : f32
    %89 = vector.broadcast %cst_31 : f32 to vector<2x32xf32>
    %90 = arith.maximumf %88, %89 : vector<2x32xf32>
    %91 = vector.extract_strided_slice %2 {offsets = [0, 5], sizes = [2, 1], strides = [1, 1]} : vector<2x8xf32> to vector<2x1xf32>
    %92 = vector.broadcast %91 : vector<2x1xf32> to vector<2x32xf32>
    %93 = vector.broadcast %4 : vector<1x32xf32> to vector<2x32xf32>
    %94 = arith.mulf %92, %93 : vector<2x32xf32>
    %cst_32 = arith.constant dense<0.000000e+00> : vector<2x32xf32>
    %95 = tpu.matmul %84, %5, %cst_32 {dimension_numbers = #tpu.dot_dimension_numbers<[1], [0], [0], [1], [0, 0, 1, 1], [], []>} : vector<2x32xf32>, vector<32x32xf32>, vector<2x32xf32> -> vector<2x32xf32>
    %96 = arith.addf %94, %95 : vector<2x32xf32>
    %97 = vector.broadcast %6 : vector<1x32xf32> to vector<2x32xf32>
    %98 = arith.addf %96, %97 : vector<2x32xf32>
    %cst_33 = arith.constant 0.000000e+00 : f32
    %99 = vector.broadcast %cst_33 : f32 to vector<2x32xf32>
    %100 = arith.maximumf %98, %99 : vector<2x32xf32>
    %101 = tpu.concatenate %100, %90 in 1 : vector<2x32xf32>, vector<2x32xf32> -> vector<2x64xf32>
    %cst_34 = arith.constant dense<0.000000e+00> : vector<2x32xf32>
    %102 = tpu.matmul %101, %7, %cst_34 {dimension_numbers = #tpu.dot_dimension_numbers<[1], [0], [0], [1], [0, 0, 1, 1], [], []>} : vector<2x64xf32>, vector<64x32xf32>, vector<2x32xf32> -> vector<2x32xf32>
    %103 = vector.broadcast %8 : vector<1x32xf32> to vector<2x32xf32>
    %104 = arith.addf %102, %103 : vector<2x32xf32>
    %cst_35 = arith.constant 0.000000e+00 : f32
    %105 = vector.broadcast %cst_35 : f32 to vector<2x32xf32>
    %106 = arith.maximumf %104, %105 : vector<2x32xf32>
    %107 = vector.extract_strided_slice %2 {offsets = [0, 6], sizes = [2, 1], strides = [1, 1]} : vector<2x8xf32> to vector<2x1xf32>
    %108 = vector.broadcast %107 : vector<2x1xf32> to vector<2x32xf32>
    %109 = vector.broadcast %4 : vector<1x32xf32> to vector<2x32xf32>
    %110 = arith.mulf %108, %109 : vector<2x32xf32>
    %cst_36 = arith.constant dense<0.000000e+00> : vector<2x32xf32>
    %111 = tpu.matmul %100, %5, %cst_36 {dimension_numbers = #tpu.dot_dimension_numbers<[1], [0], [0], [1], [0, 0, 1, 1], [], []>} : vector<2x32xf32>, vector<32x32xf32>, vector<2x32xf32> -> vector<2x32xf32>
    %112 = arith.addf %110, %111 : vector<2x32xf32>
    %113 = vector.broadcast %6 : vector<1x32xf32> to vector<2x32xf32>
    %114 = arith.addf %112, %113 : vector<2x32xf32>
    %cst_37 = arith.constant 0.000000e+00 : f32
    %115 = vector.broadcast %cst_37 : f32 to vector<2x32xf32>
    %116 = arith.maximumf %114, %115 : vector<2x32xf32>
    %117 = tpu.concatenate %116, %106 in 1 : vector<2x32xf32>, vector<2x32xf32> -> vector<2x64xf32>
    %cst_38 = arith.constant dense<0.000000e+00> : vector<2x32xf32>
    %118 = tpu.matmul %117, %7, %cst_38 {dimension_numbers = #tpu.dot_dimension_numbers<[1], [0], [0], [1], [0, 0, 1, 1], [], []>} : vector<2x64xf32>, vector<64x32xf32>, vector<2x32xf32> -> vector<2x32xf32>
    %119 = vector.broadcast %8 : vector<1x32xf32> to vector<2x32xf32>
    %120 = arith.addf %118, %119 : vector<2x32xf32>
    %cst_39 = arith.constant 0.000000e+00 : f32
    %121 = vector.broadcast %cst_39 : f32 to vector<2x32xf32>
    %122 = arith.maximumf %120, %121 : vector<2x32xf32>
    %123 = vector.extract_strided_slice %2 {offsets = [0, 7], sizes = [2, 1], strides = [1, 1]} : vector<2x8xf32> to vector<2x1xf32>
    %124 = vector.broadcast %123 : vector<2x1xf32> to vector<2x32xf32>
    %125 = vector.broadcast %4 : vector<1x32xf32> to vector<2x32xf32>
    %126 = arith.mulf %124, %125 : vector<2x32xf32>
    %cst_40 = arith.constant dense<0.000000e+00> : vector<2x32xf32>
    %127 = tpu.matmul %116, %5, %cst_40 {dimension_numbers = #tpu.dot_dimension_numbers<[1], [0], [0], [1], [0, 0, 1, 1], [], []>} : vector<2x32xf32>, vector<32x32xf32>, vector<2x32xf32> -> vector<2x32xf32>
    %128 = arith.addf %126, %127 : vector<2x32xf32>
    %129 = vector.broadcast %6 : vector<1x32xf32> to vector<2x32xf32>
    %130 = arith.addf %128, %129 : vector<2x32xf32>
    %cst_41 = arith.constant 0.000000e+00 : f32
    %131 = vector.broadcast %cst_41 : f32 to vector<2x32xf32>
    %132 = arith.maximumf %130, %131 : vector<2x32xf32>
    %133 = tpu.concatenate %132, %122 in 1 : vector<2x32xf32>, vector<2x32xf32> -> vector<2x64xf32>
    %cst_42 = arith.constant dense<0.000000e+00> : vector<2x32xf32>
    %134 = tpu.matmul %133, %7, %cst_42 {dimension_numbers = #tpu.dot_dimension_numbers<[1], [0], [0], [1], [0, 0, 1, 1], [], []>} : vector<2x64xf32>, vector<64x32xf32>, vector<2x32xf32> -> vector<2x32xf32>
    %135 = vector.broadcast %8 : vector<1x32xf32> to vector<2x32xf32>
    %136 = arith.addf %134, %135 : vector<2x32xf32>
    %cst_43 = arith.constant 0.000000e+00 : f32
    %137 = vector.broadcast %cst_43 : f32 to vector<2x32xf32>
    %138 = arith.maximumf %136, %137 : vector<2x32xf32>
    %139 = tpu.concatenate %26, %42, %58, %74, %90, %106, %122, %138 in 1 : vector<2x32xf32>, vector<2x32xf32>, vector<2x32xf32>, vector<2x32xf32>, vector<2x32xf32>, vector<2x32xf32>, vector<2x32xf32>, vector<2x32xf32> -> vector<2x256xf32>
    %c0_44 = arith.constant 0 : index
    %c0_45 = arith.constant 0 : index
    %140 = vector.load %arg6[%c0_44, %c0_45] : memref<256x24xf32, #tpu.memory_space<vmem>>, vector<256x24xf32>
    %cst_46 = arith.constant dense<0.000000e+00> : vector<2x24xf32>
    %141 = tpu.matmul %139, %140, %cst_46 {dimension_numbers = #tpu.dot_dimension_numbers<[1], [0], [0], [1], [0, 0, 1, 1], [], []>} : vector<2x256xf32>, vector<256x24xf32>, vector<2x24xf32> -> vector<2x24xf32>
    %c0_47 = arith.constant 0 : index
    %c0_48 = arith.constant 0 : index
    %142 = vector.load %arg7[%c0_47, %c0_48] : memref<1x1xf32, #tpu.memory_space<vmem>>, vector<1x1xf32>
    %143 = vector.broadcast %142 : vector<1x1xf32> to vector<2x24xf32>
    %144 = arith.addf %141, %143 : vector<2x24xf32>
    %cst_49 = arith.constant 0.000000e+00 : f32
    %145 = vector.broadcast %cst_49 : f32 to vector<2x24xf32>
    %146 = arith.cmpf one, %0, %145 : vector<2x24xf32>
    %147 = arith.extui %146 : vector<2x24xi1> to vector<2x24xi32>
    %148 = arith.sitofp %147 : vector<2x24xi32> to vector<2x24xf32>
    %149 = math.tanh %144 : vector<2x24xf32>
    %cst_50 = arith.constant 9.99999974E-6 : f32
    %150 = vector.broadcast %cst_50 : f32 to vector<2x24xf32>
    %151 = arith.addf %149, %150 : vector<2x24xf32>
    %152 = arith.mulf %151, %148 : vector<2x24xf32>
    %153 = vector.extract_strided_slice %152 {offsets = [0, 0], sizes = [2, 8], strides = [1, 1]} : vector<2x24xf32> to vector<2x8xf32>
    %154 = vector.extract_strided_slice %152 {offsets = [0, 8], sizes = [2, 8], strides = [1, 1]} : vector<2x24xf32> to vector<2x8xf32>
    %155 = vector.extract_strided_slice %152 {offsets = [0, 16], sizes = [2, 8], strides = [1, 1]} : vector<2x24xf32> to vector<2x8xf32>
    %156 = arith.subf %155, %154 : vector<2x8xf32>
    %157 = arith.subf %2, %3 : vector<2x8xf32>
    %c0_51 = arith.constant 0 : index
    %c0_52 = arith.constant 0 : index
    %158 = vector.load %arg8[%c0_51, %c0_52] : memref<8x8xf32, #tpu.memory_space<vmem>>, vector<8x8xf32>
    %cst_53 = arith.constant dense<0.000000e+00> : vector<2x8xf32>
    %159 = tpu.matmul %156, %158, %cst_53 {dimension_numbers = #tpu.dot_dimension_numbers<[1], [0], [0], [1], [0, 0, 1, 1], [], []>} : vector<2x8xf32>, vector<8x8xf32>, vector<2x8xf32> -> vector<2x8xf32>
    %c0_54 = arith.constant 0 : index
    %c0_55 = arith.constant 0 : index
    %160 = vector.load %arg9[%c0_54, %c0_55] : memref<1x8xf32, #tpu.memory_space<vmem>>, vector<1x8xf32>
    %161 = vector.broadcast %160 : vector<1x8xf32> to vector<2x8xf32>
    %162 = arith.addf %159, %161 : vector<2x8xf32>
    %163 = arith.subf %157, %162 : vector<2x8xf32>
    %cst_56 = arith.constant 0.000000e+00 : f32
    %164 = vector.broadcast %cst_56 : f32 to vector<2x8xf32>
    %165 = arith.maximumf %163, %164 : vector<2x8xf32>
    %166 = arith.addf %1, %153 : vector<2x8xf32>
    %cst_57 = arith.constant 9.99999974E-6 : f32
    %167 = vector.broadcast %cst_57 : f32 to vector<2x8xf32>
    %168 = arith.subf %167, %166 : vector<2x8xf32>
    %cst_58 = arith.constant 0.000000e+00 : f32
    %169 = vector.broadcast %cst_58 : f32 to vector<2x8xf32>
    %170 = arith.maximumf %168, %169 : vector<2x8xf32>
    %171 = tpu.concatenate %153, %156, %165, %170 in 1 : vector<2x8xf32>, vector<2x8xf32>, vector<2x8xf32>, vector<2x8xf32> -> vector<2x32xf32>
    %c0_59 = arith.constant 0 : index
    %c0_60 = arith.constant 0 : index
    %172 = vector.load %arg10[%c0_59, %c0_60] : memref<2x32xf32, #tpu.memory_space<vmem>>, vector<2x32xf32>
    tpu.vector_store %arg10[%c0_59, %c0_60], %171 {strides = array<i32>} : memref<2x32xf32, #tpu.memory_space<vmem>>, vector<2x32xf32>,
    return
  }
}

</mosaic_0001>

<bundles_post_ra>
// kernel: tpu_custom_call.1
= control target key start
LH: loop header
LB: loop body
LE: loop exit
PB: predicated region body
PF: predicated region fallthrough
CT: control target
= control target key end

     0   :  { %s1283_s0 = inlined_call_operand.vmem [shape: f32[2,24], index: 0, kind: input, shape index: {}]   ;;  %s1284_s1 = inlined_call_operand.vmem [shape: f32[1,32], index: 1, kind: input, shape index: {}]   ;;  %s1285_s2 = inlined_call_operand.vmem [shape: f32[32,32], index: 2, kind: input, shape index: {}]   ;;  %s1286_s3 = inlined_call_operand.vmem [shape: f32[1,32], index: 3, kind: input, shape index: {}]   ;;  %s1287_s4 = inlined_call_operand.vmem [shape: f32[64,32], index: 4, kind: input, shape index: {}]   ;;  %s1288_s5 = inlined_call_operand.vmem [shape: f32[1,32], index: 5, kind: input, shape index: {}]   ;;  %s1289_s6 = inlined_call_operand.vmem [shape: f32[256,24], index: 6, kind: input, shape index: {}]   ;;  %s1290_s7 = inlined_call_operand.<no memory space> [shape: f32[1,1], index: 7, kind: input, shape index: {}]   ;;  %s1291_s8 = inlined_call_operand.vmem [shape: f32[8,8], index: 8, kind: input, shape index: {}]   ;;  %s1292_s9 = inlined_call_operand.vmem [shape: f32[1,8], index: 9, kind: input, shape index: {}]   ;;  %s1293_s10 = inlined_call_operand.hbm [shape: f32[2,32], index: 10, kind: output, shape index: {}]  }
   0x1   :  { %v15_v0 = vstv %s1290_s7 }
   0x2   :  { %16 = vst [vmem:[#allocation2] sm:$0x1] %v15_v0 }
   0x3   :  { %v886_v1 = vld [vmem:[%s1285_s2 + $0x18] sm:$0xff]  ;;  %v891_v2 = vld [vmem:[%s1285_s2 + $0x10] sm:$0xff]  ;;  %v897_v3 = vld [vmem:[%s1283_s0] sm:$0x3]  ;;  %v807_v4 = vmov 8  }
   0x4   :  { %79 = vmatpush.msra.mxu1 %v886_v1  ;;  %765 = vset.pattern.permute.xlu0 %v807_v4  ;;  %v902_v5 = vld [vmem:[%s1285_s2 + $0x8] sm:$0xff]  ;;  %v908_v6 = vld [vmem:[%s1287_s4 + $0x38] sm:$0xff]  ;;  %v915_v7 = vld [vmem:[%s1285_s2] sm:$0xff] }
   0x5   :  { %56 = vperm.xlu0 %765, %v897_v3   ;;  %142 = vmatpush.msra.mxu2 %v886_v1  ;;  %v920_v8 = vld [vmem:[%s1287_s4 + $0x30] sm:$0xff] }
   0x6   :  { %80 = vmatpush.msra.mxu1 %v891_v2  ;;  %169 = vmatpush.msra.mxu3 %v908_v6 }
   0x7   :  { %143 = vmatpush.msra.mxu2 %v891_v2  ;;  %262 = vmatpush.msra.mxu0 %v886_v1 }
   0x8   :  { %81 = vmatpush.msra.mxu1 %v902_v5  ;;  %170 = vmatpush.msra.mxu3 %v920_v8 }
   0x9   :  { %17 = vsyncpa [#allocation4], 0  ;;  %v930_v9 = vld [vmem:[%s1287_s4 + $0x28] sm:$0xff]  ;;  %144 = vmatpush.msra.mxu2 %v902_v5  ;;  %263 = vmatpush.msra.mxu0 %v891_v2  ;;  %v808_v10 = vmov 0.0   ;;  %v953_v11 = vld [vmem:[%s1287_s4 + $0x20] sm:$0xff]  ;;  %v809_v16 = vmov 9  }
   0xa   :  { %82 = vmatpush.msra.mxu1 %v915_v7  ;;  %171 = vmatpush.msra.mxu3 %v930_v9  ;;  %v961_v12 = vld [vmem:[%s1287_s4 + $0x18] sm:$0xff]  ;;  %v968_v13 = vld [vmem:[%s1287_s4 + $0x10] sm:$0xff]  ;;  %v976_v14 = vld [vmem:[%s1287_s4 + $0x8] sm:$0xff]  ;;  %vm63_vm0 = vcmask 261120   ;;  %vm97_vm1 = vcmask 523264   ;;  %v810_v26 = vmov 10  }
   0xb   :  { %83 = vmatmul.f32.vlgmr.msra.gmra.mxu1 %v808_v10  ;;  %145 = vmatpush.msra.mxu2 %v915_v7  ;;  %v983_v15 = vld [vmem:[%s1287_s4] sm:$0xff]  ;;  %s811_s7 = smov 32   ;;  %v812_v45 = vmov 11   ;;  %v813_v49 = vmov 12   ;;  %v814_v58 = vmov 13   ;;  %s818_s13 = smov 64  }
   0xc   :  { %109 = vmatpush.msrb.mxu1 %v908_v6  ;;  %264 = vmatpush.msra.mxu0 %v902_v5  ;;  %v1006_v17 = vld [vmem:[%s1284_s1] ss:$0 sm:$0xff]  ;;  %vm557_vm2 = vcmask 785408   ;;  %vm641_vm3 = vcmp.ne.f32.partialorder %v897_v3, 0.0  ;;  %s822_s14 = smov 112   ;;  %vm664_vm4 = vcmask 64512  }
   0xd   :  { %202 = vmatpush.msrb.mxu2 %v886_v1  ;;  %172 = vmatpush.msra.mxu3 %v953_v11  ;;  %v1012_v20 = vld [vmem:[%s1286_s3] ss:$0 sm:$0xff]  ;;  %vm708_vm5 = vcmask 130048   ;;  %s824_s17 = smov [#allocation3]   ;;  %s721_s19 = sshll.u32 %s1293_s10, 4  ;;  %vm710_vm6 = vcmask 195584   ;;  %s722_s19 = int_to_ptr.hbm [resolvable:$true] %s721_s19 }
   0xe   :  { %110 = vmatpush.msrb.mxu1 %v920_v8  ;;  %265 = vmatpush.msra.mxu0 %v915_v7  ;;  %v1033_v27 = vld [vmem:[%s1288_s5] ss:$0 sm:$0xff]  ;;  %s816_s5 = smov 96   ;;  %vm712_vm7 = vcmask 254976  }
   0xf   :  { %203 = vmatpush.msrb.mxu2 %v891_v2  ;;  %173 = vmatpush.msra.mxu3 %v961_v12 }
  0x10   :  { %111 = vmatpush.msrb.mxu1 %v930_v9  ;;  %349 = vmatpush.msrb.mxu0 %v908_v6 }
  0x11   :  { %204 = vmatpush.msrb.mxu2 %v902_v5  ;;  %174 = vmatpush.msra.mxu3 %v968_v13 }
  0x12   :  { %350 = vmatpush.msrb.mxu0 %v920_v8  ;;  %112 = vmatpush.msrb.mxu1 %v953_v11 }
  0x13   :  { %205 = vmatpush.msrb.mxu2 %v915_v7  ;;  %175 = vmatpush.msra.mxu3 %v976_v14 }
  0x14   :  { %351 = vmatpush.msrb.mxu0 %v930_v9  ;;  %113 = vmatpush.msrb.mxu1 %v961_v12 }
  0x15   :  { %176 = vmatpush.msra.mxu3 %v983_v15  ;;  %766 = vset.pattern.permute.xlu0 %v809_v16 }
  0x16   :  { %352 = vmatpush.msrb.mxu0 %v953_v11  ;;  %114 = vmatpush.msrb.mxu1 %v968_v13 }
  0x17   :  { %322 = vmatpush.msrb.mxu3 %v886_v1  ;;  %123 = vperm.xlu0 %766, %v897_v3  }
  0x18   :  { %353 = vmatpush.msrb.mxu0 %v961_v12  ;;  %115 = vmatpush.msrb.mxu1 %v976_v14 }
  0x19   :  { %323 = vmatpush.msrb.mxu3 %v891_v2  ;;  %767 = vset.pattern.permute.xlu1 %v810_v26 }
  0x1a   :  { %354 = vmatpush.msrb.mxu0 %v968_v13  ;;  %116 = vmatpush.msrb.mxu1 %v983_v15 }
  0x1b   :  { %324 = vmatpush.msrb.mxu3 %v902_v5  ;;  %768 = vset.pattern.permute.xlu2 %v812_v45  ;;  %v567_v45 = vld [vmem:[%s1289_s6 + $0x28] sm:$0xff] }
  0x1c   :  { %355 = vmatpush.msrb.mxu0 %v976_v14  ;;  %289 = vmatpush.msra.mxu1 %v908_v6 }
  0x1d   :  { %325 = vmatpush.msrb.mxu3 %v915_v7 }
  0x1e   :  { %356 = vmatpush.msrb.mxu0 %v983_v15  ;;  %290 = vmatpush.msra.mxu1 %v920_v8 }
  0x20   :  { %291 = vmatpush.msra.mxu1 %v930_v9 }
  0x22   :  { %292 = vmatpush.msra.mxu1 %v953_v11 }
  0x24   :  { %293 = vmatpush.msra.mxu1 %v961_v12 }
  0x26   :  { %294 = vmatpush.msra.mxu1 %v968_v13 }
  0x28   :  { %295 = vmatpush.msra.mxu1 %v976_v14 }
  0x2a   :  { %296 = vmatpush.msra.mxu1 %v983_v15 }
  0x77   :  { %v57_v18 = vpop.permute.xlu0 %56 }
  0x78   :  { %v62_v19 = vmul.f32 %v1006_v17, %v57_v18 }
  0x88   :  { %v84_v21 = vpop.f32.mrf.mxu1 }
  0x89   :  { %v87_v22 = vadd.f32 %v84_v21, %v62_v19  ;;  %v124_v28 = vpop.permute.xlu0 %123 }
  0x8a   :  { %v126_v31 = vmul.f32 %v1006_v17, %v124_v28 }
  0x8b   :  { %v91_v23 = vadd.f32 %v1012_v20, %v87_v22 }
  0x8d   :  { %v92_v24 = vmax.f32 %v91_v23, 0.0 }
  0x8f   :  { %731 = vmatmul.msk.f32.vlgmr.msra.gmra.mxu2 %vm63_vm0, %v92_v24  ;;  %v93_v25 = vsel %vm63_vm0, %v92_v24, 0.0 }
  0x90   :  { %730 = vmatmul.msk.f32.vlgmr.msrb.gmra.mxu1 %vm97_vm1, %v93_v25  ;;  %229 = vmatpush.msra.mxu2 %v908_v6 }
  0x91   :  { %442 = vmatpush.msrb.mxu1 %v886_v1 }
  0x92   :  { %230 = vmatpush.msra.mxu2 %v920_v8 }
  0x93   :  { %443 = vmatpush.msrb.mxu1 %v891_v2 }
  0x94   :  { %231 = vmatpush.msra.mxu2 %v930_v9 }
  0x95   :  { %444 = vmatpush.msrb.mxu1 %v902_v5 }
  0x96   :  { %232 = vmatpush.msra.mxu2 %v953_v11 }
  0x97   :  { %445 = vmatpush.msrb.mxu1 %v915_v7 }
  0x98   :  { %233 = vmatpush.msra.mxu2 %v961_v12 }
  0x9a   :  { %234 = vmatpush.msra.mxu2 %v968_v13 }
  0x9c   :  { %235 = vmatpush.msra.mxu2 %v976_v14 }
  0x9e   :  { %236 = vmatpush.msra.mxu2 %v983_v15 }
 0x10d   :  { %v118_v29 = vpop.f32.mrf.mxu1 }
 0x10e   :  { %v1036_v30 = vadd.f32 %v1033_v27, %v118_v29  ;;  %v817_v29 = vmov 15  }
 0x110   :  { %v121_v32 = vmax.f32 %v1036_v30, 0.0 }
 0x112   :  { %v147_v33 = vpop.f32.mrf.mxu2  ;;  %154 = vrot.lane.b32.xlu1 %v121_v32, %s811_s7 }
 0x113   :  { %v150_v34 = vadd.f32 %v147_v33, %v126_v31  ;;  %v577_v31 = vld [vmem:[%s1289_s6 + $0x78] sm:$0xff]  ;;  %v576_v33 = vld [vmem:[%s1289_s6 + $0x70] sm:$0xff] }
 0x115   :  { %v151_v35 = vadd.f32 %v1012_v20, %v150_v34  ;;  %v575_v34 = vld [vmem:[%s1289_s6 + $0x68] sm:$0xff] }
 0x117   :  { %v152_v36 = vmax.f32 %v151_v35, 0.0  ;;  %v574_v35 = vld [vmem:[%s1289_s6 + $0x60] sm:$0xff] }
 0x119   :  { %733 = vmatmul.msk.f32.vlgmr.msrb.gmra.mxu2 %vm63_vm0, %v152_v36 }
 0x11a   :  { %183 = vperm.xlu1 %767, %v897_v3   ;;  %382 = vmatpush.msrb.mxu2 %v886_v1 }
 0x11c   :  { %383 = vmatpush.msrb.mxu2 %v891_v2 }
 0x11e   :  { %384 = vmatpush.msrb.mxu2 %v902_v5 }
 0x120   :  { %385 = vmatpush.msrb.mxu2 %v915_v7 }
 0x122   :  { %770 = vset.pattern.permute.xlu1 %v814_v58 }
 0x184   :  { %v155_v37 = vpop.permute.xlu1 %154 }
 0x185   :  { %v157_v38 = vsel %vm63_vm0, %v152_v36, %v155_v37  ;;  %v573_v36 = vld [vmem:[%s1289_s6 + $0x58] sm:$0xff]  ;;  %v572_v37 = vld [vmem:[%s1289_s6 + $0x50] sm:$0xff] }
 0x186   :  { %732 = vmatmul.msk.f32.vlgmr.msra.gmra.mxu3 %vm97_vm1, %v157_v38  ;;  %v571_v38 = vld [vmem:[%s1289_s6 + $0x48] sm:$0xff] }
 0x187   :  { %409 = vmatpush.msra.mxu3 %v908_v6 }
 0x189   :  { %410 = vmatpush.msra.mxu3 %v920_v8 }
 0x18b   :  { %411 = vmatpush.msra.mxu3 %v930_v9 }
 0x18c   :  { %v184_v39 = vpop.permute.xlu1 %183 }
 0x18d   :  { %412 = vmatpush.msra.mxu3 %v953_v11  ;;  %v186_v40 = vmul.f32 %v1006_v17, %v184_v39 }
 0x18f   :  { %413 = vmatpush.msra.mxu3 %v961_v12 }
 0x191   :  { %414 = vmatpush.msra.mxu3 %v968_v13 }
 0x193   :  { %415 = vmatpush.msra.mxu3 %v976_v14 }
 0x195   :  { %416 = vmatpush.msra.mxu3 %v983_v15 }
 0x19c   :  { %v207_v41 = vpop.f32.mrf.mxu2 }
 0x19d   :  { %v210_v42 = vadd.f32 %v207_v41, %v186_v40 }
 0x19f   :  { %v211_v43 = vadd.f32 %v1012_v20, %v210_v42  ;;  %v570_v42 = vld [vmem:[%s1289_s6 + $0x40] sm:$0xff] }
 0x1a1   :  { %v212_v44 = vmax.f32 %v211_v43, 0.0  ;;  %v569_v43 = vld [vmem:[%s1289_s6 + $0x38] sm:$0xff] }
 0x1a3   :  { %735 = vmatmul.msk.f32.vlgmr.msra.gmra.mxu0 %vm63_vm0, %v212_v44 }
 0x1a4   :  { %502 = vmatpush.msra.mxu0 %v886_v1 }
 0x1a6   :  { %503 = vmatpush.msra.mxu0 %v891_v2 }
 0x1a8   :  { %504 = vmatpush.msra.mxu0 %v902_v5 }
 0x1aa   :  { %505 = vmatpush.msra.mxu0 %v915_v7 }
 0x209   :  { %v178_v46 = vpop.f32.mrf.mxu3 }
 0x20a   :  { %v179_v47 = vadd.f32 %v1033_v27, %v178_v46  ;;  %v566_v46 = vld [vmem:[%s1289_s6 + $0x20] sm:$0xff] }
 0x20c   :  { %v181_v48 = vmax.f32 %v179_v47, 0.0  ;;  %v565_v47 = vld [vmem:[%s1289_s6 + $0x18] sm:$0xff] }
 0x20e   :  { %214 = vrot.lane.b32.xlu2 %v181_v48, %s811_s7  ;;  %v564_v48 = vld [vmem:[%s1289_s6 + $0x10] sm:$0xff] }
 0x216   :  { %243 = vperm.xlu2 %768, %v897_v3  }
 0x21e   :  { %769 = vset.pattern.permute.xlu2 %v813_v49  ;;  %v563_v49 = vld [vmem:[%s1289_s6 + $0x8] sm:$0xff] }
 0x21f   :  { %303 = vperm.xlu2 %769, %v897_v3  }
 0x220   :  { %v267_v54 = vpop.f32.mrf.mxu0 }
 0x227   :  { %772 = vset.pattern.permute.xlu2 %v817_v29 }
 0x268   :  { %v1071_v50 = vpop.permute.xlu2 %214 }
 0x269   :  { %v217_v51 = vsel %vm63_vm0, %v212_v44, %v1071_v50  ;;  %v568_v44 = vld [vmem:[%s1289_s6 + $0x30] sm:$0xff] }
 0x26a   :  { %734 = vmatmul.msk.f32.vlgmr.msra.gmra.mxu2 %vm97_vm1, %v217_v51  ;;  %v562_v51 = vld [vmem:[%s1289_s6] sm:$0xff] }
 0x26b   :  { %469 = vmatpush.msra.mxu2 %v908_v6 }
 0x26d   :  { %470 = vmatpush.msra.mxu2 %v920_v8 }
 0x26f   :  { %471 = vmatpush.msra.mxu2 %v930_v9 }
 0x270   :  { %v244_v52 = vpop.permute.xlu2 %243 }
 0x271   :  { %v246_v53 = vmul.f32 %v1006_v17, %v244_v52  ;;  %472 = vmatpush.msra.mxu2 %v953_v11  ;;  %v777_v52 = vld [vmem:[#allocation2] ss:$0 sm:$0xff] }
 0x273   :  { %v270_v55 = vadd.f32 %v267_v54, %v246_v53  ;;  %473 = vmatpush.msra.mxu2 %v961_v12  ;;  %v819_v53 = vmov 0  }
 0x275   :  { %v271_v56 = vadd.f32 %v1012_v20, %v270_v55  ;;  %474 = vmatpush.msra.mxu2 %v968_v13 }
 0x277   :  { %v272_v57 = vmax.f32 %v271_v56, 0.0  ;;  %475 = vmatpush.msra.mxu2 %v976_v14 }
 0x279   :  { %737 = vmatmul.msk.f32.vlgmr.msrb.gmra.mxu3 %vm63_vm0, %v272_v57  ;;  %476 = vmatpush.msra.mxu2 %v983_v15  ;;  %v304_v62 = vpop.permute.xlu2 %303 }
 0x27a   :  { %v306_v63 = vmul.f32 %v1006_v17, %v304_v62  ;;  %601 = vmatpush.msrb.mxu3 %v577_v31 }
 0x27c   :  { %602 = vmatpush.msrb.mxu3 %v576_v33  ;;  %v578_v33 = vld [vmem:[%s1289_s6 + $0x80] sm:$0xff] }
 0x27e   :  { %603 = vmatpush.msrb.mxu3 %v575_v34 }
 0x280   :  { %604 = vmatpush.msrb.mxu3 %v574_v35 }
 0x282   :  { %605 = vmatpush.msrb.mxu3 %v573_v36 }
 0x284   :  { %606 = vmatpush.msrb.mxu3 %v572_v37 }
 0x286   :  { %607 = vmatpush.msrb.mxu3 %v571_v38 }
 0x288   :  { %608 = vmatpush.msrb.mxu3 %v570_v42 }
 0x28a   :  { %609 = vmatpush.msrb.mxu3 %v569_v43 }
 0x28c   :  { %610 = vmatpush.msrb.mxu3 %v568_v44 }
 0x28e   :  { %611 = vmatpush.msrb.mxu3 %v567_v45 }
 0x290   :  { %612 = vmatpush.msrb.mxu3 %v566_v46  ;;  %v745_v46 = vsel %vm641_vm3, 1.0, %v808_v10  ;;  %v778_v10 = vld [vmem:[%s1292_s9] ss:$0 sm:$0xff]  ;;  %s719_s9 = sshll.u32 %s824_s17, 4  ;;  %s720_s9 = int_to_ptr.vmem [resolvable:$true] %s719_s9 }
 0x292   :  { %613 = vmatpush.msrb.mxu3 %v565_v47 }
 0x294   :  { %614 = vmatpush.msrb.mxu3 %v564_v48 }
 0x296   :  { %615 = vmatpush.msrb.mxu3 %v563_v49 }
 0x298   :  { %616 = vmatpush.msrb.mxu3 %v562_v51 }
 0x2ed   :  { %v238_v59 = vpop.f32.mrf.mxu2 }
 0x2ee   :  { %v1088_v60 = vadd.f32 %v1033_v27, %v238_v59 }
 0x2f0   :  { %v241_v61 = vmax.f32 %v1088_v60, 0.0 }
 0x2f2   :  { %274 = vrot.lane.b32.xlu1 %v241_v61, %s811_s7 }
 0x2fa   :  { %363 = vperm.xlu1 %770, %v897_v3  }
 0x2fc   :  { %v327_v0 = vpop.f32.mrf.mxu3 }
 0x2fd   :  { %v330_v1 = vadd.f32 %v327_v0, %v306_v63 }
 0x2ff   :  { %v331_v2 = vadd.f32 %v1012_v20, %v330_v1 }
 0x301   :  { %v332_v4 = vmax.f32 %v331_v2, 0.0 }
 0x303   :  { %739 = vmatmul.msk.f32.vlgmr.msrb.gmra.mxu2 %vm63_vm0, %v332_v4 }
 0x364   :  { %v275_v5 = vpop.permute.xlu1 %274 }
 0x365   :  { %v277_v7 = vsel %vm63_vm0, %v272_v57, %v275_v5  ;;  %v555_v57 = vsel %vm63_vm0, %v121_v32, %v1071_v50 }
 0x366   :  { %736 = vmatmul.msk.f32.vlgmr.msra.gmra.mxu1 %vm97_vm1, %v277_v7 }
 0x367   :  { %529 = vmatpush.msra.mxu1 %v908_v6 }
 0x369   :  { %530 = vmatpush.msra.mxu1 %v920_v8 }
 0x36b   :  { %531 = vmatpush.msra.mxu1 %v930_v9  ;;  %v815_v9 = vmov 14  }
 0x36c   :  { %v364_v16 = vpop.permute.xlu1 %363  ;;  %771 = vset.pattern.permute.xlu0 %v815_v9  ;;  %v589_v9 = vld [vmem:[%s1289_s6 + $0xd8] sm:$0xff] }
 0x36d   :  { %532 = vmatpush.msra.mxu1 %v953_v11  ;;  %v366_v18 = vmul.f32 %v1006_v17, %v364_v16 }
 0x36f   :  { %533 = vmatpush.msra.mxu1 %v961_v12 }
 0x371   :  { %534 = vmatpush.msra.mxu1 %v968_v13 }
 0x373   :  { %535 = vmatpush.msra.mxu1 %v976_v14 }
 0x375   :  { %536 = vmatpush.msra.mxu1 %v983_v15 }
 0x386   :  { %v387_v19 = vpop.f32.mrf.mxu2 }
 0x387   :  { %v390_v21 = vadd.f32 %v387_v19, %v366_v18 }
 0x389   :  { %v1110_v6 = vadd.f32 %v1012_v20, %v390_v21 }
 0x38b   :  { %v392_v8 = vmax.f32 %v1110_v6, 0.0  ;;  %v593_v6 = vld [vmem:[%s1289_s6 + $0xf8] sm:$0xff] }
 0x38d   :  { %741 = vmatmul.msk.f32.vlgmr.msrb.gmra.mxu1 %vm63_vm0, %v392_v8 }
 0x3e3   :  { %v298_v11 = vpop.f32.mrf.mxu1 }
 0x3e4   :  { %v299_v12 = vadd.f32 %v1033_v27, %v298_v11  ;;  %v588_v11 = vld [vmem:[%s1289_s6 + $0xd0] sm:$0xff] }
 0x3e6   :  { %v301_v13 = vmax.f32 %v299_v12, 0.0  ;;  %v587_v12 = vld [vmem:[%s1289_s6 + $0xc8] sm:$0xff] }
 0x3e8   :  { %334 = vrot.lane.b32.xlu0 %v301_v13, %s811_s7 }
 0x3f0   :  { %423 = vperm.xlu0 %771, %v897_v3  }
 0x3f8   :  { %545 = vrot.lane.b32.xlu0 %v301_v13, %s816_s5  ;;  %v586_v13 = vld [vmem:[%s1289_s6 + $0xc0] sm:$0xff] }
 0x3f9   :  { %773 = vset.pattern.permute.xlu0 %v819_v53 }
 0x400   :  { %598 = vperm.xlu0 %773, %v777_v52  }
 0x40a   :  { %v447_v24 = vpop.f32.mrf.mxu1 }
 0x45a   :  { %v335_v14 = vpop.permute.xlu0 %334 }
 0x45b   :  { %v337_v15 = vsel %vm63_vm0, %v332_v4, %v335_v14  ;;  %v585_v14 = vld [vmem:[%s1289_s6 + $0xb8] sm:$0xff] }
 0x45c   :  { %738 = vmatmul.msk.f32.vlgmr.msrb.gmra.mxu0 %vm97_vm1, %v337_v15  ;;  %v584_v15 = vld [vmem:[%s1289_s6 + $0xb0] sm:$0xff] }
 0x45d   :  { %621 = vmatpush.msrb.mxu0 %v593_v6 }
 0x462   :  { %v424_v22 = vpop.permute.xlu0 %423 }
 0x463   :  { %v426_v23 = vmul.f32 %v1006_v17, %v424_v22  ;;  %v583_v22 = vld [vmem:[%s1289_s6 + $0xa8] sm:$0xff] }
 0x465   :  { %v450_v25 = vadd.f32 %v447_v24, %v426_v23  ;;  %v582_v23 = vld [vmem:[%s1289_s6 + $0xa0] sm:$0xff]  ;;  %v581_v24 = vld [vmem:[%s1289_s6 + $0x98] sm:$0xff] }
 0x467   :  { %v1124_v26 = vadd.f32 %v1012_v20, %v450_v25  ;;  %v580_v25 = vld [vmem:[%s1289_s6 + $0x90] sm:$0xff] }
 0x469   :  { %v452_v28 = vmax.f32 %v1124_v26, 0.0  ;;  %v579_v26 = vld [vmem:[%s1289_s6 + $0x88] sm:$0xff] }
 0x46a   :  { %v546_v59 = vpop.permute.xlu0 %545 }
 0x46b   :  { %743 = vmatmul.msk.f32.vlgmr.msra.gmra.mxu0 %vm63_vm0, %v452_v28 }
 0x4d9   :  { %v358_v39 = vpop.f32.mrf.mxu0 }
 0x4da   :  { %v1152_v40 = vadd.f32 %v1033_v27, %v358_v39 }
 0x4dc   :  { %v361_v41 = vmax.f32 %v1152_v40, 0.0 }
 0x4de   :  { %394 = vrot.lane.b32.xlu2 %v361_v41, %s811_s7 }
 0x4e6   :  { %483 = vperm.xlu2 %772, %v897_v3  }
 0x4e8   :  { %v507_v5 = vpop.f32.mrf.mxu0 }
 0x4ee   :  { %542 = vrot.lane.b32.xlu2 %v241_v61, %s818_s13 }
 0x538   :  { %v395_v54 = vpop.permute.xlu2 %394 }
 0x539   :  { %v397_v55 = vsel %vm63_vm0, %v392_v8, %v395_v54  ;;  %v592_v8 = vld [vmem:[%s1289_s6 + $0xf0] sm:$0xff] }
 0x53a   :  { %740 = vmatmul.msk.f32.vlgmr.msra.gmra.mxu3 %vm97_vm1, %v397_v55  ;;  %622 = vmatpush.msrb.mxu0 %v592_v8 }
 0x540   :  { %v484_v56 = vpop.permute.xlu2 %483 }
 0x541   :  { %v486_v4 = vmul.f32 %v1006_v17, %v484_v56  ;;  %v591_v17 = vld [vmem:[%s1289_s6 + $0xe8] sm:$0xff] }
 0x542   :  { %623 = vmatpush.msrb.mxu0 %v591_v17 }
 0x543   :  { %v510_v7 = vadd.f32 %v507_v5, %v486_v4 }
 0x545   :  { %v511_v16 = vadd.f32 %v1012_v20, %v510_v7  ;;  %v590_v20 = vld [vmem:[%s1289_s6 + $0xe0] sm:$0xff]  ;;  %s820_s6 = smov 8  }
 0x546   :  { %624 = vmatpush.msrb.mxu0 %v590_v20 }
 0x547   :  { %v512_v18 = vmax.f32 %v511_v16, 0.0 }
 0x548   :  { %v543_v58 = vpop.permute.xlu2 %542  ;;  %625 = vmatpush.msrb.mxu0 %v589_v9 }
 0x549   :  { %v556_v60 = vsel %vm97_vm1, %v555_v57, %v543_v58 }
 0x54a   :  { %v558_v61 = vsel %vm557_vm2, %v556_v60, %v546_v59  ;;  %626 = vmatpush.msrb.mxu0 %v588_v11 }
 0x54b   :  { %617 = vmatmul.f32.vlgmr.msrb.gmra.mxu3 %v558_v61 }
 0x54c   :  { %627 = vmatpush.msrb.mxu0 %v587_v12 }
 0x54e   :  { %628 = vmatpush.msrb.mxu0 %v586_v13 }
 0x550   :  { %629 = vmatpush.msrb.mxu0 %v585_v14 }
 0x552   :  { %630 = vmatpush.msrb.mxu0 %v584_v15 }
 0x554   :  { %631 = vmatpush.msrb.mxu0 %v583_v22 }
 0x556   :  { %632 = vmatpush.msrb.mxu0 %v582_v23 }
 0x558   :  { %633 = vmatpush.msrb.mxu0 %v581_v24 }
 0x55a   :  { %634 = vmatpush.msrb.mxu0 %v580_v25 }
 0x55c   :  { %635 = vmatpush.msrb.mxu0 %v579_v26 }
 0x55e   :  { %636 = vmatpush.msrb.mxu0 %v578_v33 }
 0x5bd   :  { %v418_v62 = vpop.f32.mrf.mxu3 }
 0x5be   :  { %v419_v63 = vadd.f32 %v1033_v27, %v418_v62 }
 0x5c0   :  { %v421_v0 = vmax.f32 %v419_v63, 0.0 }
 0x5c2   :  { %454 = vrot.lane.b32.xlu1 %v421_v0, %s811_s7 }
 0x5ce   :  { %v618_v39 = vpop.f32.mrf.mxu3 }
 0x634   :  { %v455_v1 = vpop.permute.xlu1 %454 }
 0x635   :  { %v457_v30 = vsel %vm63_vm0, %v452_v28, %v455_v1  ;;  %v559_v35 = vsel %vm63_vm0, %v361_v41, %v455_v1  ;;  %v656_v41 = vld [vmem:[%s1291_s8] sm:$0xff]  ;;  %s823_s8 = smov 24  }
 0x636   :  { %742 = vmatmul.msk.f32.vlgmr.msra.gmra.mxu2 %vm97_vm1, %v457_v30 }
 0x637   :  { %682 = vmatpush.msrb.mxu2 %v656_v41 }
 0x6b9   :  { %v478_v32 = vpop.f32.mrf.mxu2 }
 0x6ba   :  { %v479_v50 = vadd.f32 %v1033_v27, %v478_v32 }
 0x6bc   :  { %v481_v2 = vmax.f32 %v479_v50, 0.0 }
 0x6be   :  { %514 = vrot.lane.b32.xlu1 %v481_v2, %s811_s7 }
 0x6c6   :  { %548 = vrot.lane.b32.xlu1 %v481_v2, %s818_s13 }
 0x730   :  { %v515_v19 = vpop.permute.xlu1 %514 }
 0x731   :  { %v517_v21 = vsel %vm63_vm0, %v512_v18, %v515_v19 }
 0x732   :  { %744 = vmatmul.msk.f32.vlgmr.msra.gmra.mxu1 %vm97_vm1, %v517_v21 }
 0x738   :  { %v549_v34 = vpop.permute.xlu1 %548 }
 0x739   :  { %v560_v36 = vsel %vm97_vm1, %v559_v35, %v549_v34 }
 0x7af   :  { %v538_v28 = vpop.f32.mrf.mxu1 }
 0x7b0   :  { %v539_v29 = vadd.f32 %v1033_v27, %v538_v28  ;;  %v599_v27 = vpop.permute.xlu0 %598 }
 0x7b1   :  { %v619_v42 = vadd.f32 %v618_v39, %v599_v27 }
 0x7b2   :  { %v541_v31 = vmax.f32 %v539_v29, 0.0 }
 0x7b4   :  { %552 = vrot.lane.b32.xlu2 %v541_v31, %s816_s5  ;;  %s821_s5 = smov 120  }
 0x80e   :  { %v553_v37 = vpop.permute.xlu2 %552 }
 0x80f   :  { %v561_v38 = vsel %vm557_vm2, %v560_v36, %v553_v37 }
 0x810   :  { %637 = vmatmul.f32.vlgmr.msrb.gmra.mxu0 %v561_v38 }
 0x88d   :  { %v638_v43 = vpop.f32.mrf.mxu0 }
 0x88e   :  { %v639_v44 = vadd.f32 %v638_v43, %v619_v42 }
 0x890   :  { %779 = vtanh.f32 %v639_v44 }
 0x896   :  { %v780_v45 = vpop.eup %779 }
 0x897   :  { %v645_v40 = vadd.f32 1e-05, %v780_v45 }
 0x899   :  { %v646_v47 = vmul.f32 %v745_v46, %v645_v40 }
 0x89b   :  { %648 = vrot.lane.b32.xlu1 %v646_v47, %s820_s6  ;;  %v693_v54 = vadd.f32 %v646_v47, %v897_v3 }
 0x89d   :  { %v694_v55 = vsub.f32 1e-05, %v693_v54 }
 0x89f   :  { %v695_v56 = vmax.f32 %v694_v55, 0.0 }
 0x8a3   :  { %652 = vrot.lane.b32.xlu1 %v897_v3, %s821_s5 }
 0x90d   :  { %v649_v48 = vpop.permute.xlu1 %648 }
 0x90e   :  { %v651_v49 = vsub.f32 %v646_v47, %v649_v48 }
 0x910   :  { %696 = vrot.lane.b32.xlu0 %v651_v49, %s821_s5  ;;  %662 = vrot.lane.b32.xlu2 %v651_v49, %s822_s14 }
 0x915   :  { %v653_v57 = vpop.permute.xlu1 %652 }
 0x916   :  { %v655_v58 = vsub.f32 %v897_v3, %v653_v57 }
 0x96a   :  { %v663_v51 = vpop.permute.xlu2 %662 }
 0x96b   :  { %746 = vmatmul.msk.f32.vlgmr.msrb.gmra.mxu2 %vm664_vm4, %v663_v51 }
 0x982   :  { %v697_v62 = vpop.permute.xlu0 %696 }
 0x983   :  { %v707_v63 = vsel %vm664_vm4, %v646_v47, %v697_v62 }
 0x9ee   :  { %v684_v52 = vpop.f32.mrf.mxu2 }
 0x9ef   :  { %v685_v53 = vadd.f32 %v778_v10, %v684_v52 }
 0x9f1   :  { %688 = vrot.lane.b32.xlu2 %v685_v53, %s820_s6 }
 0x9f9   :  { %704 = vrot.lane.b32.xlu2 %v695_v56, %s823_s8 }
 0xa4b   :  { %v689_v59 = vpop.permute.xlu2 %688 }
 0xa4c   :  { %v691_v60 = vsub.f32 %v655_v58, %v689_v59 }
 0xa4e   :  { %v692_v61 = vmax.f32 %v691_v60, 0.0 }
 0xa50   :  { %700 = vrot.lane.b32.xlu1 %v692_v61, %s820_s6 }
 0xa53   :  { %v705_v1 = vpop.permute.xlu2 %704 }
 0xac2   :  { %v701_v0 = vpop.permute.xlu1 %700 }
 0xac3   :  { %v709_v30 = vsel %vm708_vm5, %v707_v63, %v701_v0 }
 0xac4   :  { %v711_v3 = vsel %vm710_vm6, %v709_v30, %v705_v1 }
 0xac5   :  { %713 = vst.msk [vmem:[#allocation3] sm:$0x3] %vm712_vm7, %v711_v3 }
 0xac6   :  { %724 = dma.vmem_to_hbm [thread:$0]  %s720_s9, 32, %s722_s19, [#allocation4]  }
 0xac7   :  { %805 = dma.done.wait [#allocation4], 32  }
 0xac8   :  { %806 = vsyncadd [#allocation4], 4294967264 }
 0xac9   :  { %729 = vsyncpa [#allocation4], 1 }

</bundles_post_ra>
